<compile_context>
chip_gen: v6e
topology: v6e:2x2x1
jax: 0.10.0
libtpu: 0.0.40
codegen_flags: <defaults>
</compile_context>

<pallas_src>
import jax
import jax.numpy as jnp
from jax.experimental import pallas as pl
from jax.experimental.pallas import tpu as pltpu


def edge_mlp_kernel(g_ref, idx_ref, b1_ref, w2T_ref, b2_ref, w3_ref, b3_ref,
                    out_ref):
    g = g_ref[...]                                              # (H1, N) = (h@W1)^T
    n_nodes = g.shape[1]
    te = idx_ref.shape[1]

    # Combined one-hot gather: sel[n, e] = (src[e]==n) + (dst[e]==n) in {0,1,2}.
    node_ids = jax.lax.broadcasted_iota(jnp.int32, (n_nodes, te), 0)
    sel = ((node_ids == idx_ref[0:1, :]).astype(g.dtype)
           + (node_ids == idx_ref[1:2, :]).astype(g.dtype))     # (N, te)

    # h1^T = relu((m @ W1 + b1)^T) = relu(G @ sel + b1)   (exact: sel is 0/1/2)
    h1 = jnp.maximum(
        jnp.dot(g, sel, preferred_element_type=jnp.float32)
        + b1_ref[...], 0.0)                                     # (H1, te)
    h2 = (jnp.dot(w2T_ref[...], h1, preferred_element_type=jnp.float32)
          + b2_ref[...])                                        # (H2, te)

    # EGCNApply: linear(relu(.)) as VPU multiply + sublane reduce.
    h3 = jnp.maximum(h2, 0.0)                                   # (H2, te)
    out = jnp.sum(h3 * w3_ref[...], axis=0, keepdims=True) + b3_ref[0, 0]
    out_ref[...] = out.astype(out_ref.dtype)                    # (1, te) lane-dense


def _choose_te(e):
    # >= 2 tiles when E allows (v7x 2-TC sharding of the "parallel" axis),
    # each tile >= 512 lanes (amortize per-grid-step overhead), <= 8192
    # (bound the (N, te) one-hot footprint).
    half = pl.cdiv(e, 2)
    return max(512, min(8192, pl.cdiv(half, 128) * 128))


def edge_mlp_readout(h, src, dst, params, *, te=None):
    """h: (N, D) node features; src/dst: (E,) int32 endpoints. Returns (E,)."""
    w1, b1, w2, b2, w3, b3 = params
    n_nodes, d = h.shape
    h1_dim = w1.shape[1]
    h2_dim = w2.shape[1]
    e = src.shape[0]

    # --- G-fusion: fold W1 into the node table once (per node, not per edge).
    hp = jax.lax.Precision.HIGHEST
    g = jnp.dot(h, w1, precision=hp).T                          # (H1, N)

    # Lane-major weights/biases (features on sublanes, edges on lanes).
    w2T = w2.T                                                  # (H2, H1)
    b1c = b1.reshape(h1_dim, 1)
    b2c = b2.reshape(h2_dim, 1)
    w3c = w3.reshape(h2_dim, 1)
    b3s = b3.reshape(1, 1)

    # --- Tile selection + edge padding (padded edges use node id -1 -> all-zero
    # one-hot column -> harmless; sliced off below).
    if te is None:
        te = _choose_te(e)
    n_tiles = pl.cdiv(e, te)
    e_pad = n_tiles * te
    pad = e_pad - e
    idx = jnp.stack([src.astype(jnp.int32), dst.astype(jnp.int32)])   # (2, E)
    idx_p = jnp.pad(idx, ((0, 0), (0, pad)), constant_values=-1)      # (2, e_pad)

    # --- VMEM budget: per-tile resident footprint vs. the most conservative
    # scoped-VMEM default (16 MiB on v5e; 32 MiB scoped on v6e / v7x-64MiB).
    f32 = 4
    per_tile = (
        n_nodes * te * f32                       # (N, te) one-hot operand
        + (h1_dim + h2_dim + 1) * te * f32       # h1, h2, out intermediates
        + 2 * (2 * te * 4)                       # double-buffered idx blocks
        + 2 * (1 * te * f32)                     # double-buffered out blocks
    )
    const = 2 * (h1_dim * n_nodes + h1_dim + h2_dim * h1_dim + 2 * h2_dim) * f32
    vmem_est = per_tile + const
    # TODO(synk): above ~24 MiB, switch the gather to a DMA row gather of G.
    assert vmem_est <= 24 * 1024 * 1024, (
        f"estimated VMEM {vmem_est/2**20:.1f} MiB too large; shrink te or use "
        "a DMA row gather for the node table")
    compiler_kwargs = dict(dimension_semantics=("parallel",))
    if vmem_est > 12 * 1024 * 1024:
        compiler_kwargs["vmem_limit_bytes"] = min(2 * vmem_est, 32 * 1024 * 1024)

    out = pl.pallas_call(
        edge_mlp_kernel,
        out_shape=jax.ShapeDtypeStruct((1, e_pad), h.dtype),
        grid_spec=pltpu.PrefetchScalarGridSpec(
            num_scalar_prefetch=0,
            grid=(n_tiles,),
            in_specs=[
                pl.BlockSpec((h1_dim, n_nodes), lambda i: (0, 0)),    # G (const)
                pl.BlockSpec((2, te), lambda i: (0, i)),              # src/dst tile
                pl.BlockSpec((h1_dim, 1), lambda i: (0, 0)),          # b1
                pl.BlockSpec((h2_dim, h1_dim), lambda i: (0, 0)),     # W2^T
                pl.BlockSpec((h2_dim, 1), lambda i: (0, 0)),          # b2
                pl.BlockSpec((h2_dim, 1), lambda i: (0, 0)),          # w3 column
                pl.BlockSpec(memory_space=pltpu.MemorySpace.SMEM),    # b3 scalar
            ],
            out_specs=pl.BlockSpec((1, te), lambda i: (0, i)),        # lane-dense
        ),
        compiler_params=pltpu.CompilerParams(**compiler_kwargs),
    )(g, idx_p, b1c, w2T, b2c, w3c, b3s)

    return out[0, :e]                                            # (E,)


def init_params(key, in_dim):
    """Deterministic PyTorch-Linear-style init (uniform(-1/sqrt(fan_in), .))."""
    h1 = in_dim // 2
    h2 = in_dim // 4
    ks = jax.random.split(key, 6)

    def lin(kw, kb, fan_in, fan_out):
        bound = 1.0 / jnp.sqrt(fan_in)
        w = jax.random.uniform(kw, (fan_in, fan_out), jnp.float32, -bound, bound)
        b = jax.random.uniform(kb, (1, fan_out), jnp.float32, -bound, bound)
        return w, b

    w1, b1 = lin(ks[0], ks[1], in_dim, h1)
    w2, b2 = lin(ks[2], ks[3], h1, h2)
    w3, b3 = lin(ks[4], ks[5], h2, 1)
    return (w1, b1, w2, b2, w3, b3)


def reference(h, src, dst, params):
    w1, b1, w2, b2, w3, b3 = params
    hp = jax.lax.Precision.HIGHEST
    m = h[src] + h[dst]
    a1 = jnp.maximum(jnp.dot(m, w1, precision=hp) + b1, 0.0)
    a2 = jnp.dot(a1, w2, precision=hp) + b2
    out = jnp.dot(jnp.maximum(a2, 0.0), w3, precision=hp) + b3
    return out.squeeze(-1)


if __name__ == "__main__":
    in_dim = 32          # -> hidden 16 -> 8 -> 1
    n_nodes = 16
    n_edges = 1000       # not a tile multiple: exercises padding; auto te=512 -> 2 tiles

    key = jax.random.PRNGKey(0)
    k_h, k_src, k_dst, k_p = jax.random.split(key, 4)

    h = jax.random.normal(k_h, (n_nodes, in_dim), jnp.float32)
    src = jax.random.randint(k_src, (n_edges,), 0, n_nodes, jnp.int32)
    dst = jax.random.randint(k_dst, (n_edges,), 0, n_nodes, jnp.int32)
    params = init_params(k_p, in_dim)

    out = edge_mlp_readout(h, src, dst, params)     # auto te: 512, 2 grid steps
    out = jax.block_until_ready(out)

    ref = reference(h, src, dst, params)
    assert out.shape == (n_edges,), out.shape
    max_err = float(jnp.max(jnp.abs(out - ref)))
    # Note: in-kernel dots use default MXU precision; tolerance documented here.
    assert jnp.allclose(out, ref, atol=1e-4, rtol=1e-4), max_err

    print("KERNEL_OK")
</pallas_src>

<mosaic_0001>
module attributes {stable_mosaic.version = 11 : i64} {
  func.func @edge_mlp_kernel(%arg0: i32, %arg1: memref<16x16xf32, #tpu.memory_space<vmem>>, %arg2: memref<2x512xi32, #tpu.memory_space<vmem>>, %arg3: memref<16x1xf32, #tpu.memory_space<vmem>>, %arg4: memref<8x16xf32, #tpu.memory_space<vmem>>, %arg5: memref<8x1xf32, #tpu.memory_space<vmem>>, %arg6: memref<8x1xf32, #tpu.memory_space<vmem>>, %arg7: memref<1x1xf32, #tpu.memory_space<smem>>, %arg8: memref<1x512xf32, #tpu.memory_space<vmem>>) attributes {dimension_semantics = [#tpu.dimension_semantics<parallel>], iteration_bounds = array<i64: 2>, scalar_prefetch = 0 : i64, scratch_operands = 0 : i64, tpu.core_type = #tpu.core_type<tc>, window_params = [{pipeline_mode = #tpu.pipeline_mode<synchronous>, transform_indices = @transform_0, window_bounds = array<i64: 16, 16>}, {transform_indices = @transform_1, window_bounds = array<i64: 2, 512>}, {pipeline_mode = #tpu.pipeline_mode<synchronous>, transform_indices = @transform_2, window_bounds = array<i64: 16, 1>}, {pipeline_mode = #tpu.pipeline_mode<synchronous>, transform_indices = @transform_3, window_bounds = array<i64: 8, 16>}, {pipeline_mode = #tpu.pipeline_mode<synchronous>, transform_indices = @transform_4, window_bounds = array<i64: 8, 1>}, {pipeline_mode = #tpu.pipeline_mode<synchronous>, transform_indices = @transform_5, window_bounds = array<i64: 8, 1>}, {transform_indices = @transform_6, window_bounds = array<i64: 1, 1>}, {transform_indices = @transform_7, window_bounds = array<i64: 1, 512>}]} {
    %c0 = arith.constant 0 : index
    %c0_0 = arith.constant 0 : index
    %0 = vector.load %arg1[%c0, %c0_0] : memref<16x16xf32, #tpu.memory_space<vmem>>, vector<16x16xf32>
    %1 = tpu.iota {dimensions = array<i32: 0>} : vector<16x512xi32>
    %c0_1 = arith.constant 0 : index
    %c0_2 = arith.constant 0 : index
    %2 = vector.load %arg2[%c0_1, %c0_2] : memref<2x512xi32, #tpu.memory_space<vmem>>, vector<1x512xi32>
    %3 = vector.broadcast %2 : vector<1x512xi32> to vector<16x512xi32>
    %4 = arith.cmpi eq, %1, %3 : vector<16x512xi32>
    %5 = arith.extui %4 : vector<16x512xi1> to vector<16x512xi32>
    %6 = arith.sitofp %5 : vector<16x512xi32> to vector<16x512xf32>
    %c1 = arith.constant 1 : index
    %c0_3 = arith.constant 0 : index
    %7 = vector.load %arg2[%c1, %c0_3] : memref<2x512xi32, #tpu.memory_space<vmem>>, vector<1x512xi32>
    %8 = vector.broadcast %7 : vector<1x512xi32> to vector<16x512xi32>
    %9 = arith.cmpi eq, %1, %8 : vector<16x512xi32>
    %10 = arith.extui %9 : vector<16x512xi1> to vector<16x512xi32>
    %11 = arith.sitofp %10 : vector<16x512xi32> to vector<16x512xf32>
    %12 = arith.addf %6, %11 : vector<16x512xf32>
    %cst = arith.constant dense<0.000000e+00> : vector<16x512xf32>
    %13 = tpu.matmul %0, %12, %cst {dimension_numbers = #tpu.dot_dimension_numbers<[1], [0], [0], [1], [0, 0, 1, 1], [], []>} : vector<16x16xf32>, vector<16x512xf32>, vector<16x512xf32> -> vector<16x512xf32>
    %c0_4 = arith.constant 0 : index
    %c0_5 = arith.constant 0 : index
    %14 = vector.load %arg3[%c0_4, %c0_5] : memref<16x1xf32, #tpu.memory_space<vmem>>, vector<16x1xf32>
    %15 = vector.broadcast %14 : vector<16x1xf32> to vector<16x512xf32>
    %16 = arith.addf %13, %15 : vector<16x512xf32>
    %cst_6 = arith.constant 0.000000e+00 : f32
    %17 = vector.broadcast %cst_6 : f32 to vector<16x512xf32>
    %18 = arith.maximumf %16, %17 : vector<16x512xf32>
    %c0_7 = arith.constant 0 : index
    %c0_8 = arith.constant 0 : index
    %19 = vector.load %arg4[%c0_7, %c0_8] : memref<8x16xf32, #tpu.memory_space<vmem>>, vector<8x16xf32>
    %cst_9 = arith.constant dense<0.000000e+00> : vector<8x512xf32>
    %20 = tpu.matmul %19, %18, %cst_9 {dimension_numbers = #tpu.dot_dimension_numbers<[1], [0], [0], [1], [0, 0, 1, 1], [], []>} : vector<8x16xf32>, vector<16x512xf32>, vector<8x512xf32> -> vector<8x512xf32>
    %c0_10 = arith.constant 0 : index
    %c0_11 = arith.constant 0 : index
    %21 = vector.load %arg5[%c0_10, %c0_11] : memref<8x1xf32, #tpu.memory_space<vmem>>, vector<8x1xf32>
    %22 = vector.broadcast %21 : vector<8x1xf32> to vector<8x512xf32>
    %23 = arith.addf %20, %22 : vector<8x512xf32>
    %cst_12 = arith.constant 0.000000e+00 : f32
    %24 = vector.broadcast %cst_12 : f32 to vector<8x512xf32>
    %25 = arith.maximumf %23, %24 : vector<8x512xf32>
    %c0_13 = arith.constant 0 : index
    %c0_14 = arith.constant 0 : index
    %26 = vector.load %arg6[%c0_13, %c0_14] : memref<8x1xf32, #tpu.memory_space<vmem>>, vector<8x1xf32>
    %27 = vector.broadcast %26 : vector<8x1xf32> to vector<8x512xf32>
    %28 = arith.mulf %25, %27 : vector<8x512xf32>
    %cst_15 = arith.constant dense<0.000000e+00> : vector<512xf32>
    %29 = vector.multi_reduction <add>, %28, %cst_15 [0] : vector<8x512xf32> to vector<512xf32>
    %30 = vector.shape_cast %29 : vector<512xf32> to vector<1x512xf32>
    %c0_16 = arith.constant 0 : index
    %c0_17 = arith.constant 0 : index
    %31 = memref.load %arg7[%c0_16, %c0_17] : memref<1x1xf32, #tpu.memory_space<smem>>
    %32 = vector.broadcast %31 : f32 to vector<1x512xf32>
    %33 = arith.addf %30, %32 : vector<1x512xf32>
    %c0_18 = arith.constant 0 : index
    %c0_19 = arith.constant 0 : index
    %34 = vector.load %arg8[%c0_18, %c0_19] : memref<1x512xf32, #tpu.memory_space<vmem>>, vector<1x512xf32>
    tpu.vector_store %arg8[%c0_18, %c0_19], %33 {strides = array<i32>} : memref<1x512xf32, #tpu.memory_space<vmem>>, vector<1x512xf32>,
    return
  }
  func.func @transform_0(%arg0: i32) -> (i32, i32) {
    %c0_i32 = arith.constant 0 : i32
    %c0_i32_0 = arith.constant 0 : i32
    %c0_i32_1 = arith.constant 0 : i32
    return %c0_i32, %c0_i32_0 : i32, i32
  }
  func.func @transform_1(%arg0: i32) -> (i32, i32) {
    %c0_i32 = arith.constant 0 : i32
    %c0_i32_0 = arith.constant 0 : i32
    return %c0_i32, %arg0 : i32, i32
  }
  func.func @transform_2(%arg0: i32) -> (i32, i32) {
    %c0_i32 = arith.constant 0 : i32
    %c0_i32_0 = arith.constant 0 : i32
    %c0_i32_1 = arith.constant 0 : i32
    return %c0_i32, %c0_i32_0 : i32, i32
  }
  func.func @transform_3(%arg0: i32) -> (i32, i32) {
    %c0_i32 = arith.constant 0 : i32
    %c0_i32_0 = arith.constant 0 : i32
    %c0_i32_1 = arith.constant 0 : i32
    return %c0_i32, %c0_i32_0 : i32, i32
  }
  func.func @transform_4(%arg0: i32) -> (i32, i32) {
    %c0_i32 = arith.constant 0 : i32
    %c0_i32_0 = arith.constant 0 : i32
    %c0_i32_1 = arith.constant 0 : i32
    return %c0_i32, %c0_i32_0 : i32, i32
  }
  func.func @transform_5(%arg0: i32) -> (i32, i32) {
    %c0_i32 = arith.constant 0 : i32
    %c0_i32_0 = arith.constant 0 : i32
    %c0_i32_1 = arith.constant 0 : i32
    return %c0_i32, %c0_i32_0 : i32, i32
  }
  func.func @transform_6(%arg0: i32) -> (i32, i32) {
    %c0_i32 = arith.constant 0 : i32
    %c0_i32_0 = arith.constant 0 : i32
    %c0_i32_1 = arith.constant 0 : i32
    return %c0_i32, %c0_i32_0 : i32, i32
  }
  func.func @transform_7(%arg0: i32) -> (i32, i32) {
    %c0_i32 = arith.constant 0 : i32
    %c0_i32_0 = arith.constant 0 : i32
    return %c0_i32, %arg0 : i32, i32
  }
}

</mosaic_0001>

<bundles_post_ra>
// kernel: tpu_custom_call.1
= control target key start
LH: loop header
LB: loop body
LE: loop exit
PB: predicated region body
PF: predicated region fallthrough
CT: control target
= control target key end

     0   :  { %s1204_s0 = inlined_call_operand.vmem [shape: f32[16,16], index: 0, kind: input, shape index: {}]   ;;  %s1205_s1 = inlined_call_operand.vmem [shape: s32[2,1024], index: 1, kind: input, shape index: {}]   ;;  %s1206_s2 = inlined_call_operand.vmem [shape: f32[16,1], index: 2, kind: input, shape index: {}]   ;;  %s1207_s3 = inlined_call_operand.vmem [shape: f32[8,16], index: 3, kind: input, shape index: {}]   ;;  %s1208_s4 = inlined_call_operand.vmem [shape: f32[8,1], index: 4, kind: input, shape index: {}]   ;;  %s1209_s5 = inlined_call_operand.vmem [shape: f32[8,1], index: 5, kind: input, shape index: {}]   ;;  %s1210_s6 = inlined_call_operand.<no memory space> [shape: f32[1,1], index: 6, kind: input, shape index: {}]   ;;  %s1211_s7 = inlined_call_operand.hbm [shape: f32[1,1024], index: 7, kind: output, shape index: {}]  }
   0x1   :  { %12 = sst [smem:[#allocation2]] %s1210_s6 }
   0x2   :  { %13 = vsyncpa [#allocation4], 0 }
   0x3   :  { %15 = vsyncpa [#allocation4 + $0x1], 0  ;;  %s1051_s26 = smov 0   ;;  %s1053_s27 = smov 0  }
   0x4   :  { %s1055_s28 = smov 0   ;;  %s1057_s29 = smov 0  }
   0x5 LB: > { %s1072_s6 = sadd.s32 4294967295, %s1002_s29   ;;  %s862_s30 = sadd.s32 4294967294, %s1002_s29   ;;  %s1002_s29 = sphi %s1057_s29, %s1217_s29   ;;  %s998_s28 = sphi %s1055_s28, %s1216_s28   ;;  %s994_s27 = sphi %s1053_s27, %s1215_s27   ;;  %s990_s26 = sphi %s1051_s26, %s1214_s26  }
   0x6   : > { %s1076_s8 = sadd.s32 1, %s1002_s29   ;;  %s180_s9 = sadd.s32 1, %s998_s28 }
   0x7   : > { %s177_s10 = ssub.s32 %s1002_s29, %s1076_s8  ;;  %p190_p0 = scmp.ne.s32.totalorder %s998_s28, %s994_s27 }
   0x8   : > { %p178_p1 = scmp.eq.s32.totalorder %s177_s10, 0  ;;  %p191_p2 = scmp.eq.s32.totalorder %s1072_s6, 1 }
   0x9   : > { %p196_p3 = scmp.ne.s32.totalorder %s994_s27, %s990_s26  ;;  %p197_p4 = scmp.eq.s32.totalorder %s862_s30, 1 }
   0xa   : > { %s1087_s11 = scalar_select %p178_p1, %s998_s28, %s180_s9  }
   0xb   : > { %p1089_p5 = por %p191_p2, %p190_p0  ;;  %p1093_p6 = por %p197_p4, %p196_p3 }
   0xc   : > { %p865_p7 = scmp.ge.s32.totalorder %s1002_s29, 1  ;;  %p242_p8 = scmp.lt.s32.totalorder %s1002_s29, 3 }
   0xe   : > { %p243_p9 = pnand %p865_p7, %p242_p8 }
   0xf   : > { %s867_s14 = sshll.u32 (!%p243_p9), %s1072_s6, 2  ;;  %s748_s18 = sld [smem:[#allocation2]] (!%p243_p9) }
  0x10   : > { %246 = sbr.rel (%p243_p9) target bundleno = 485 (0x1e5), region = 48  ;;  %p275_p10 = scmp.lt.s32.totalorder (!%p243_p9), %s867_s14, 7 }
  0x11   : > { %s897_s21 = sshll.u32 (!%p243_p9), %s1072_s6, 6 }
  0x12   : > { %s801_s30 = scalar_lea.hbm (!%p243_p9), %s1211_s7, %s897_s21 }
  0x15   : > { %v283_v0 = vlaneseq  ;;  %v1004_v1 = vmov 0.0   ;;  %v378_v2 = vld [vmem:[%s1206_s2 + $0x8] sm:$0xff]  ;;  %v1005_v4 = vmov 0   ;;  %s1219_s14 = smov (!%p275_p10, %s867_s14), 7  ;;  %v377_v7 = vld [vmem:[%s1206_s2] sm:$0xff] }
  0x16   : > { %460 = vmatprep.mubr.f32.mxu0 %v1004_v1  ;;  %537 = vmatprep.mubr.f32.mxu1 %v1004_v1  ;;  %s868_s19 = sshll.u32 %s1219_s14, 1  ;;  %v281_v44 = vld [vmem:[%s1204_s0] sm:$0xff]  ;;  %v282_v46 = vld [vmem:[%s1204_s0 + $0x8] sm:$0xff]  ;;  %s1007_s14 = smov [#allocation3]  }
  0x17   : > { %v1106_v3 = vshrl.u32 %v283_v0, 7  ;;  %940 = vset.pattern.permute.xlu0 %v1005_v4  ;;  %941 = vset.pattern.permute.xlu1 %v1005_v4  ;;  %s278_s22 = scalar_lea.vmem %s1205_s1, %s868_s19  ;;  %v559_v47 = vld [vmem:[%s1208_s4] sm:$0xff]  ;;  %s271_s19 = sand.u32 1, %s994_s27  }
  0x18   : > { %386 = vperm.xlu0 %940, %v378_v2   ;;  %v286_v11 = vld [vmem:[%s278_s22] ss:$2 sm:$0xf]  ;;  %v877_v12 = vld [vmem:[%s278_s22 + $0x1] ss:$2 sm:$0xf]  ;;  %562 = vperm.xlu1 %941, %v559_v47  }
  0x19   : > { %v293_v5 = vsub.s32 1, %v1106_v3  ;;  %v301_v6 = vsub.s32 3, %v1106_v3  ;;  %v289_v8 = vsub.s32 0, %v1106_v3  ;;  %v297_v9 = vsub.s32 2, %v1106_v3  ;;  %v714_v48 = vld [vmem:[%s1209_s5] sm:$0xff]  ;;  %s866_s20 = sshll.u32 %s271_s19, 2 }
  0x1a   : > { %v285_v10 = vadd.s32 8, %v1106_v3  ;;  %s273_s22 = scalar_lea.vmem [#allocation3], %s866_s20  ;;  %s789_s9 = scalar_lea.sflag [#allocation4], %s271_s19 }
  0x1b   : > { %v294_v13 = vrot.slane %v286_v11, %v293_v5  ;;  %v336_v14 = vrot.slane %v877_v12, %v293_v5  ;;  %v302_v15 = vrot.slane %v286_v11, %v301_v6  ;;  %v344_v16 = vrot.slane %v877_v12, %v301_v6  ;;  %s803_s23 = sshll.u32 %s273_s22, 4  ;;  %s946_s6 = sshll.u32 %s1007_s14, 4  ;;  %s804_s23 = int_to_ptr.vmem [resolvable:$true] %s803_s23  ;;  %s947_s6 = int_to_ptr.vmem [resolvable:$false] %s946_s6 }
  0x1c   : > { %381 = vperm.xlu0 %940, %v377_v7   ;;  %v290_v17 = vrot.slane %v286_v11, %v289_v8  ;;  %v332_v18 = vrot.slane %v877_v12, %v289_v8  ;;  %v298_v19 = vrot.slane %v286_v11, %v297_v9  ;;  %v340_v20 = vrot.slane %v877_v12, %v297_v9  ;;  %v558_v12 = vld [vmem:[%s1207_s3] sm:$0xff]  ;;  %s942_s10 = scalar_lea.vmem %s804_s23, 64  ;;  %s948_s15 = scalar_lea.vmem %s947_s6, 128 }
  0x1d   : > { %vm308_vm0 = vcmp.eq.s32.totalorder %v285_v10, %v294_v13  ;;  %vm350_vm1 = vcmp.eq.s32.totalorder %v285_v10, %v336_v14  ;;  %vm310_vm2 = vcmp.eq.s32.totalorder %v285_v10, %v302_v15  ;;  %vm352_vm3 = vcmp.eq.s32.totalorder %v285_v10, %v344_v16  ;;  %717 = vperm.xlu1 %941, %v714_v48   ;;  %p943_p11 = scmp.ne.s32.totalorder %s804_s23, %s942_s10  ;;  %p949_p0 = scmp.lt.s32.totalorder %s804_s23, %s947_s6 }
  0x1e   : > { %v874_v21 = vsel %vm308_vm0, 1.0, %v1004_v1  ;;  %v883_v22 = vsel %vm350_vm1, 1.0, %v1004_v1  ;;  %v876_v23 = vsel %vm310_vm2, 1.0, %v1004_v1  ;;  %v885_v24 = vsel %vm352_vm3, 1.0, %v1004_v1  ;;  %p950_p1 = scmp.lt.s32.totalorder %s948_s15, %s942_s10 }
  0x1f   : > { %v374_v25 = vadd.f32 %v883_v22, %v874_v21  ;;  %v376_v26 = vadd.f32 %v885_v24, %v876_v23  ;;  %vm307_vm4 = vcmp.eq.s32.totalorder %v285_v10, %v290_v17  ;;  %vm349_vm5 = vcmp.eq.s32.totalorder %v285_v10, %v332_v18  ;;  %p944_p12 = pnand %p943_p11, %p1089_p5 }
  0x20   : > { %v873_v27 = vsel %vm307_vm4, 1.0, %v1004_v1  ;;  %v882_v28 = vsel %vm349_vm5, 1.0, %v1004_v1  ;;  %vm309_vm6 = vcmp.eq.s32.totalorder %v285_v10, %v298_v19  ;;  %vm351_vm7 = vcmp.eq.s32.totalorder %v285_v10, %v340_v20  ;;  %p951_p2 = por %p950_p1, %p949_p0 }
  0x21   : > { %424 = vmatprep.subr.mxu0 %v374_v25  ;;  %501 = vmatprep.subr.mxu1 %v376_v26  ;;  %v373_v29 = vadd.f32 %v882_v28, %v873_v27  ;;  %v875_v30 = vsel %vm309_vm6, 1.0, %v1004_v1  ;;  %v884_v31 = vsel %vm351_vm7, 1.0, %v1004_v1  ;;  %vm304_vm8 = vcmp.eq.s32.totalorder %v1106_v3, %v294_v13  ;;  %p945_p13 = pneg %p944_p12 }
  0x22   : > { %v375_v32 = vadd.f32 %v884_v31, %v875_v30  ;;  %v870_v33 = vsel %vm304_vm8, 1.0, %v1004_v1  ;;  %vm346_vm9 = vcmp.eq.s32.totalorder %v1106_v3, %v336_v14  ;;  %vm306_vm10 = vcmp.eq.s32.totalorder %v1106_v3, %v302_v15 }
  0x23   : > { %425 = vmatpush1.msra.mxu0 %v373_v29  ;;  %v879_v34 = vsel %vm346_vm9, 1.0, %v1004_v1  ;;  %v872_v35 = vsel %vm306_vm10, 1.0, %v1004_v1  ;;  %vm348_vm11 = vcmp.eq.s32.totalorder %v1106_v3, %v344_v16  ;;  %vm303_vm12 = vcmp.eq.s32.totalorder %v1106_v3, %v290_v17  ;;  %p952_p3 = pnand %p951_p2, %p945_p13 }
  0x24   : > { %502 = vmatpush1.msra.mxu1 %v375_v32  ;;  %v370_v36 = vadd.f32 %v879_v34, %v870_v33  ;;  %v881_v37 = vsel %vm348_vm11, 1.0, %v1004_v1  ;;  %v869_v38 = vsel %vm303_vm12, 1.0, %v1004_v1  ;;  %vm345_vm13 = vcmp.eq.s32.totalorder %v1106_v3, %v332_v18 }
  0x25   : > { %v372_v39 = vadd.f32 %v881_v37, %v872_v35  ;;  %v878_v40 = vsel %vm345_vm13, 1.0, %v1004_v1  ;;  %vm305_vm14 = vcmp.eq.s32.totalorder %v1106_v3, %v298_v19  ;;  %vm347_vm15 = vcmp.eq.s32.totalorder %v1106_v3, %v340_v20 }
  0x26   : > { %426 = vmatprep.subr.mxu0 %v370_v36  ;;  %v369_v41 = vadd.f32 %v878_v40, %v869_v38  ;;  %v871_v42 = vsel %vm305_vm14, 1.0, %v1004_v1  ;;  %v880_v43 = vsel %vm347_vm15, 1.0, %v1004_v1  ;;  %vm389_vm0 = vcmask 130048  }
  0x27   : > { %503 = vmatprep.subr.mxu1 %v372_v39  ;;  %v371_v45 = vadd.f32 %v880_v43, %v871_v42  ;;  %vm785_vm1 = vcmp.lt.s32.totalorder %v283_v0, 512 }
  0x28   : > { %427 = vmatpush1.msra.mxu0 %v369_v41 }
  0x29   : > { %504 = vmatpush1.msra.mxu1 %v371_v45  ;;  %886 = vmatmul.mubr.msk.f32.vlgmr.msra.gmra.mxu0 %vm389_vm0, %v281_v44 }
  0x2a   : > { %888 = vmatmul.mubr.msk.f32.vlgmr.msra.gmra.mxu1 %vm389_vm0, %v281_v44  ;;  %466 = vmatprep.mubr.f32.mxu0 %v1004_v1  ;;  %v1006_v44 = vmov 1966171168  }
  0x2b   : > { %543 = vmatprep.mubr.f32.mxu1 %v1004_v1  ;;  %v761_v45 = vunpack.c.l.s4 %v1006_v44 }
  0x2d   : > { %887 = vmatmul.mubr.msk.f32.gmra.mxu0 %vm389_vm0, %v282_v46 }
  0x2e   : > { %889 = vmatmul.mubr.msk.f32.gmra.mxu1 %vm389_vm0, %v282_v46  ;;  %632 = vmatprep.mubr.f32.mxu0 %v1004_v1 }
  0x2f   : > { %703 = vmatprep.mubr.f32.mxu1 %v1004_v1 }
  0x93   : > { %v387_v49 = vpop.permute.xlu0 %386  ;;  %v563_v14 = vpop.permute.xlu1 %562 }
  0x97   : > { %v382_v55 = vpop.permute.xlu0 %381 }
  0x98   : > { %v718_v25 = vpop.permute.xlu1 %717 }
  0xe9   : > { %v462_v50 = vpop.f32.mrf.mxu0 }
  0xea   : > { %v539_v51 = vpop.f32.mrf.mxu1  ;;  %v463_v63 = vadd.f32 %v462_v50, %v382_v55 }
  0xeb   : > { %v464_v52 = vpop.f32.mrf.mxu0  ;;  %v540_v4 = vadd.f32 %v539_v51, %v382_v55 }
  0xec   : > { %v541_v53 = vpop.f32.mrf.mxu1  ;;  %v465_v59 = vadd.f32 %v464_v52, %v382_v55  ;;  %v550_v10 = vmax.f32 %v463_v63, 0.0 }
  0xed   : > { %v468_v54 = vpop.f32.mrf.mxu0  ;;  %v542_v1 = vadd.f32 %v541_v53, %v382_v55  ;;  %v552_v13 = vmax.f32 %v540_v4, 0.0  ;;  %v749_v55 = vstv %s748_s18 }
  0xee   : > { %v545_v56 = vpop.f32.mrf.mxu1  ;;  %v469_v57 = vadd.f32 %v468_v54, %v387_v49  ;;  %v551_v8 = vmax.f32 %v465_v59, 0.0  ;;  %v762_v54 = vunpack.c.0.s8 %v761_v45 }
  0xef   : > { %v470_v58 = vpop.f32.mrf.mxu0  ;;  %v546_v60 = vadd.f32 %v545_v56, %v387_v49  ;;  %v553_v11 = vmax.f32 %v542_v1, 0.0 }
  0xf0   : > { %v471_v61 = vadd.f32 %v470_v58, %v387_v49  ;;  %v547_v62 = vpop.f32.mrf.mxu1  ;;  %v554_v6 = vmax.f32 %v469_v57, 0.0 }
  0xf1   : > { %v548_v2 = vadd.f32 %v547_v62, %v387_v49  ;;  %v556_v9 = vmax.f32 %v546_v60, 0.0  ;;  %v765_v62 = vsub.s32 %v762_v54, %v1106_v3 }
  0xf2   : > { %v555_v5 = vmax.f32 %v471_v61, 0.0 }
  0xf3   : > { %v557_v7 = vmax.f32 %v548_v2, 0.0 }
  0xf4   : > { %596 = vmatprep.subr.mxu0 %v555_v5 }
  0xf5   : > { %667 = vmatprep.subr.mxu1 %v557_v7  ;;  %597 = vmatpush1.msra.mxu0 %v554_v6 }
  0xf6   : > { %668 = vmatpush1.msra.mxu1 %v556_v9  ;;  %598 = vmatprep.subr.mxu0 %v551_v8 }
  0xf7   : > { %669 = vmatprep.subr.mxu1 %v553_v11  ;;  %599 = vmatpush1.msra.mxu0 %v550_v10 }
  0xf8   : > { %670 = vmatpush1.msra.mxu1 %v552_v13  ;;  %890 = vmatmul.mubr.msk.f32.vlgmr.msra.gmra.mxu0 %vm389_vm0, %v558_v12 }
  0xf9   : > { %891 = vmatmul.mubr.msk.f32.vlgmr.msra.gmra.mxu1 %vm389_vm0, %v558_v12 }
 0x1b8   : > { %v634_v15 = vpop.f32.mrf.mxu0 }
 0x1b9   : > { %v635_v16 = vadd.f32 %v634_v15, %v563_v14  ;;  %v705_v17 = vpop.f32.mrf.mxu1 }
 0x1ba   : > { %v706_v18 = vadd.f32 %v705_v17, %v563_v14  ;;  %v636_v19 = vpop.f32.mrf.mxu0 }
 0x1bb   : > { %v710_v20 = vmax.f32 %v635_v16, 0.0  ;;  %v637_v21 = vadd.f32 %v636_v19, %v563_v14  ;;  %v707_v22 = vpop.f32.mrf.mxu1 }
 0x1bc   : > { %v712_v23 = vmax.f32 %v706_v18, 0.0  ;;  %v708_v24 = vadd.f32 %v707_v22, %v563_v14 }
 0x1bd   : > { %v711_v26 = vmax.f32 %v637_v21, 0.0  ;;  %v720_v27 = vmul.f32 %v718_v25, %v710_v20 }
 0x1be   : > { %v713_v28 = vmax.f32 %v708_v24, 0.0  ;;  %v722_v29 = vmul.f32 %v718_v25, %v712_v23 }
 0x1bf   : > { %v721_v30 = vmul.f32 %v718_v25, %v711_v26  ;;  %v724_v31 = vrot.slane %v720_v27, 4 }
 0x1c0   : > { %v723_v32 = vmul.f32 %v718_v25, %v713_v28  ;;  %v736_v33 = vrot.slane %v722_v29, 4 }
 0x1c1   : > { %v725_v34 = vadd.f32 %v724_v31, %v720_v27  ;;  %v730_v35 = vrot.slane %v721_v30, 4 }
 0x1c2   : > { %v737_v36 = vadd.f32 %v736_v33, %v722_v29  ;;  %v742_v37 = vrot.slane %v723_v32, 4 }
 0x1c3   : > { %v726_v38 = vrot.slane %v725_v34, 2  ;;  %v731_v39 = vadd.f32 %v730_v35, %v721_v30 }
 0x1c4   : > { %v738_v40 = vrot.slane %v737_v36, 2  ;;  %v743_v41 = vadd.f32 %v742_v37, %v723_v32 }
 0x1c5   : > { %v727_v42 = vadd.f32 %v726_v38, %v725_v34  ;;  %v732_v43 = vrot.slane %v731_v39, 2 }
 0x1c6   : > { %v739_v46 = vadd.f32 %v738_v40, %v737_v36  ;;  %v744_v47 = vrot.slane %v743_v41, 2 }
 0x1c7   : > { %v728_v48 = vrot.slane %v727_v42, 1  ;;  %v733_v49 = vadd.f32 %v732_v43, %v731_v39 }
 0x1c8   : > { %v740_v50 = vrot.slane %v739_v46, 1  ;;  %v745_v51 = vadd.f32 %v744_v47, %v743_v41 }
 0x1c9   : > { %v729_v52 = vadd.f32 %v728_v48, %v727_v42  ;;  %v734_v53 = vrot.slane %v733_v49, 1 }
 0x1ca   : > { %v741_v56 = vadd.f32 %v740_v50, %v739_v46  ;;  %v746_v57 = vrot.slane %v745_v51, 1 }
 0x1cb   : > { %v735_v58 = vadd.f32 %v734_v53, %v733_v49  ;;  %v750_v60 = vadd.f32 %v749_v55, %v729_v52 }
 0x1cc   : > { %v747_v59 = vadd.f32 %v746_v57, %v745_v51  ;;  %v752_v63 = vadd.f32 %v749_v55, %v741_v56 }
 0x1cd   : > { %v751_v61 = vadd.f32 %v749_v55, %v735_v58 }
 0x1ce   : > { %v753_v1 = vadd.f32 %v749_v55, %v747_v59 }
 0x1cf   : > { %v758_v2 = vcombine.low %v750_v60, %v751_v61 }
 0x1d0   : > { %v759_v4 = vcombine.low %v752_v63, %v753_v1 }
 0x1d1   : > { %v766_v5 = vrot.slane %v758_v2, %v765_v62 }
 0x1d2   : > { %v773_v6 = vrot.slane %v759_v4, %v765_v62 }
 0x1d4   : > { %v774_v7 = vcombine.low %v766_v5, %v773_v6 }
 0x1d6   : > { %v781_v8 = vrot.slane %v774_v7, %v765_v62 }
 0x1d8   : > { %787 = vst.msk [vmem:[%s273_s22] sm:$0xf] %vm785_vm1, %v781_v8 }
 0x1d9   : > { %955 = shalt.err (!%p952_p3)
}
 0x1da   : > { %s956_s16 = scalar_lea.hbm %s801_s30, 64  ;;  %s960_s19 = scalar_lea.hbm %s1211_s7, 128 }
 0x1db   : > { %p957_p4 = scmp.ne.s32.totalorder %s801_s30, %s956_s16  ;;  %p961_p9 = scmp.lt.s32.totalorder %s801_s30, %s1211_s7 }
 0x1dc   : > { %p962_p10 = scmp.lt.s32.totalorder %s960_s19, %s956_s16 }
 0x1dd   : > { %p958_p7 = pnand %p957_p4, %p1089_p5 }
 0x1de   : > { %p963_p11 = por %p962_p10, %p961_p9 }
 0x1df   : > { %p959_p8 = pneg %p958_p7 }
 0x1e1   : > { %p964_p12 = pnand %p963_p11, %p959_p8 }
 0x1e3   : > { %967 = shalt.err (!%p964_p12)
}
 0x1e4   : > { %898 = dma.vmem_to_hbm [thread:$0]  (%p1089_p5), %s804_s23, 64, %s801_s30, %s789_s9  }
 0x1e5 PF: > { %p904_p13 = scmp.ge.s32.totalorder %s1002_s29, 2  ;;  %s815_s22 = sand.u32 1, %s990_s26  }
 0x1e6   : > { %s816_s24 = scalar_lea.sflag [#allocation4], %s815_s22 }
 0x1e7   : > { %p901_p0 = pnand %p904_p13, %p1093_p6 }
 0x1e9   : > { %p902_p1 = pneg %p901_p0 }
 0x1eb   : > { %985 = dma.done.wait (%p902_p1), %s816_s24, 64  }
 0x1ec   : > { %987 = vsyncadd (%p902_p1), %s816_s24, 4294967232  ;;  %p18_p2 = scmp.ge.s32.totalorder %s1076_s8, 4   ;;  %s1214_s26 = smov %s994_s27 }
 0x1ed   : > { %s1215_s27 = smov %s998_s28  ;;  %s1216_s28 = smov %s1087_s11 }
 0x1ee   : > { %s1217_s29 = smov %s1076_s8  ;;  %20 = sbr.rel (!%p18_p2) target bundleno = 5 (0x5), region = 84 }
 0x1f3   :  { %821 = vsyncpa [#allocation4], 1 }
 0x1f4   :  { %823 = vsyncpa [#allocation4 + $0x1], 1 }

</bundles_post_ra>
